<compile_context>
chip_gen: v7x
topology: tpu7x:2x2x1
jax: 0.10.0
libtpu: 0.0.40
codegen_flags: <defaults>
</compile_context>

<pallas_src>
import jax
import jax.numpy as jnp
from jax.experimental import pallas as pl
from jax.experimental.pallas import tpu as pltpu


def _vmem_limit(need_bytes):
    # Above the 16/32 MiB scoped defaults, but capped at 48 MiB so it stays
    # safe on v7x's 64 MiB physical VMEM (plenty of headroom on v5e/v6e).
    return int(min(max(2 * need_bytes, 32 * 1024 * 1024), 48 * 1024 * 1024))


# --------------------------------------------------------------------------
# Kernel 1: LLM surrogate  last_hidden_state = tanh(X @ W_llm + b_llm)
# Tiled (M//tm, N//tn, K//tk) grid, f32 accumulator, bf16 MXU operands,
# bias + tanh only on the last K step, bf16 output.
# --------------------------------------------------------------------------

def _llm_tanh_matmul_kernel(x_ref, w_ref, b_ref, o_ref, acc_ref):
    k = pl.program_id(2)

    @pl.when(k == 0)
    def _():
        acc_ref[...] = jnp.zeros_like(acc_ref)

    acc_ref[...] += jnp.dot(x_ref[...], w_ref[...],
                            preferred_element_type=jnp.float32)

    @pl.when(k == pl.num_programs(2) - 1)
    def _():
        # epilogue math stays in f32 (v5e VPU/EUP have no bf16), store bf16
        o_ref[...] = jnp.tanh(acc_ref[...] + b_ref[...]).astype(o_ref.dtype)


def pallas_llm_tanh_linear(x, w, b, *, tm=512, tn=512, tk=1024):
    """x: (M, K) bf16, w: (K, N) bf16, b: (N,) -> tanh(x @ w + b) as (M, N) bf16."""
    M, K = x.shape
    Kw, N = w.shape
    assert K == Kw
    if x.dtype != jnp.bfloat16:
        x = x.astype(jnp.bfloat16)
    if w.dtype != jnp.bfloat16:
        w = w.astype(jnp.bfloat16)
    b = b.reshape(1, N).astype(jnp.float32)

    tm, tn, tk = min(tm, M), min(tn, N), min(tk, K)
    assert M % tm == 0 and N % tn == 0 and K % tk == 0, "demo shapes tile evenly"
    grid = (M // tm, N // tn, K // tk)

    # double-buffered bf16 A/B/bias/out blocks + resident f32 accumulator
    vmem_need = 2 * (tm * tk * 2 + tk * tn * 2 + tn * 4 + tm * tn * 2) + tm * tn * 4
    cost = pl.CostEstimate(
        flops=2 * M * N * K,
        transcendentals=M * N,
        bytes_accessed=M * K * 2 + K * N * 2 + M * N * 2 + N * 4,
    )

    return pl.pallas_call(
        _llm_tanh_matmul_kernel,
        out_shape=jax.ShapeDtypeStruct((M, N), jnp.bfloat16),
        grid_spec=pltpu.PrefetchScalarGridSpec(
            num_scalar_prefetch=0,
            grid=grid,
            in_specs=[
                pl.BlockSpec((tm, tk), lambda i, j, k: (i, k)),
                pl.BlockSpec((tk, tn), lambda i, j, k: (k, j)),
                pl.BlockSpec((1, tn), lambda i, j, k: (0, j)),
            ],
            out_specs=pl.BlockSpec((tm, tn), lambda i, j, k: (i, j)),
            scratch_shapes=[pltpu.VMEM((tm, tn), jnp.float32)],
        ),
        compiler_params=pltpu.CompilerParams(
            dimension_semantics=("parallel", "parallel", "arbitrary"),
            vmem_limit_bytes=_vmem_limit(vmem_need),
        ),
        cost_estimate=cost,
    )(x, w, b)


# --------------------------------------------------------------------------
# Kernel 2 (fused): recon = gen_rows @ W_res + b_res ;
#                   per_row = 1 - cos_sim(recon, target)
# Grid (Mg//tm, K//tk); per-row matmul accumulator in VMEM; cosine term with
# rsqrt(+eps) computed on the last K step; per-row loss written to (Mg, 1)
# so the M axis stays megacore-parallel (mean is done outside).
# --------------------------------------------------------------------------

def pallas_resampler_cosine_per_row(h_rows, w_res, b_res, targets, *, tm=256, tk=1024):
    """h_rows: (Mg, K) bf16, w_res: (K, Dimg) bf16, b_res: (Dimg,),
    targets: (Mg, Dimg) -> per-row (1 - cosine) as (Mg, 1) f32."""
    Mg, K = h_rows.shape
    Kw, Dimg = w_res.shape
    assert K == Kw and targets.shape == (Mg, Dimg)
    if h_rows.dtype != jnp.bfloat16:
        h_rows = h_rows.astype(jnp.bfloat16)
    if w_res.dtype != jnp.bfloat16:
        w_res = w_res.astype(jnp.bfloat16)
    b_res = b_res.reshape(1, Dimg).astype(jnp.float32)
    targets = targets.astype(jnp.float32)

    # Keep W_res fully VMEM-resident when it is small (typical SEED shapes):
    # avoids re-streaming the weight per m tile and revisiting the accumulator.
    if K * Dimg * 2 <= 8 * 1024 * 1024:
        tk = K
    tm, tk = min(tm, Mg), min(tk, K)
    assert Mg % tm == 0 and K % tk == 0, "demo shapes tile evenly"
    grid = (Mg // tm, K // tk)
    nk = grid[1]

    def kernel(h_ref, w_ref, b_ref, t_ref, loss_ref, acc_ref):
        k = pl.program_id(1)

        @pl.when(k == 0)
        def _():
            acc_ref[...] = jnp.zeros_like(acc_ref)

        acc_ref[...] += jnp.dot(h_ref[...], w_ref[...],
                                preferred_element_type=jnp.float32)

        @pl.when(k == nk - 1)
        def _():
            rec = acc_ref[...] + b_ref[...]                     # (tm, Dimg) f32
            tgt = t_ref[...]                                    # (tm, Dimg) f32
            eps = 1e-12                                         # python float -> literal
            num = jnp.sum(rec * tgt, axis=-1, keepdims=True)    # (tm, 1)
            inv_r = jax.lax.rsqrt(jnp.sum(rec * rec, axis=-1, keepdims=True) + eps)
            inv_t = jax.lax.rsqrt(jnp.sum(tgt * tgt, axis=-1, keepdims=True) + eps)
            loss_ref[...] = (1.0 - num * inv_r * inv_t).astype(loss_ref.dtype)

    vmem_need = (2 * (tm * tk * 2 + tk * Dimg * 2 + Dimg * 4 + tm * Dimg * 4 + tm * 4)
                 + tm * Dimg * 4)
    cost = pl.CostEstimate(
        flops=2 * Mg * Dimg * K + 5 * Mg * Dimg,
        transcendentals=2 * Mg,
        bytes_accessed=Mg * K * 2 + K * Dimg * 2 + Mg * Dimg * 4 + Mg * 4,
    )

    # TODO(synk): the gen-row gather could be fused in here via scalar-prefetched
    # row indices + manual row DMA from HBM; kept outside for simplicity since
    # Mg (num_imgs * tokens_per_img) is small.
    return pl.pallas_call(
        kernel,
        out_shape=jax.ShapeDtypeStruct((Mg, 1), jnp.float32),
        grid_spec=pltpu.PrefetchScalarGridSpec(
            num_scalar_prefetch=0,
            grid=grid,
            in_specs=[
                pl.BlockSpec((tm, tk), lambda m, k: (m, k)),      # gen rows
                pl.BlockSpec((tk, Dimg), lambda m, k: (k, 0)),    # W_res
                pl.BlockSpec((1, Dimg), lambda m, k: (0, 0)),     # bias
                pl.BlockSpec((tm, Dimg), lambda m, k: (m, 0)),    # targets
            ],
            out_specs=pl.BlockSpec((tm, 1), lambda m, k: (m, 0)),
            scratch_shapes=[pltpu.VMEM((tm, Dimg), jnp.float32)],
        ),
        compiler_params=pltpu.CompilerParams(
            # M tiles are independent now -> parallel; K is the reduction.
            dimension_semantics=("parallel", "arbitrary"),
            vmem_limit_bytes=_vmem_limit(vmem_need),
        ),
        cost_estimate=cost,
    )(h_rows, w_res, b_res, targets)


# ------------------------------ module (forward) ---------------------------

class SEEDLLaMAAlignGenerationPallas:
    def __init__(self, params):
        # frozen (llm.requires_grad_(False) in the original): pre-cast ONCE so no
        # per-forward astype HBM passes are needed.
        self.embed_table = params["embed_table"].astype(jnp.bfloat16)
        self.w_llm = params["w_llm"].astype(jnp.bfloat16)
        self.b_llm = params["b_llm"].astype(jnp.float32)
        self.w_res = params["w_res"].astype(jnp.bfloat16)
        self.b_res = params["b_res"].astype(jnp.float32)

    def forward(self, input_ids, attention_mask, labels, image_embeds,
                embeds_gen_mask, embeds_cmp_mask, ids_gen_mask, ids_cmp_mask,
                *, num_imgs_for_rec=None, num_gen_tokens=None):
        # input_embeds = self.llm.get_input_embeddings()(input_ids)   (glue gather, bf16)
        input_embeds = jnp.take(self.embed_table, input_ids, axis=0)  # (B, S, D)
        bz, sq, dim = input_embeds.shape

        # output_lm = self.llm(...); last_hidden_state = hidden_states[-1]
        # (attention_mask / labels accepted; LM loss discarded by original forward)
        x2d = input_embeds.reshape(bz * sq, dim)
        last_hidden_state = pallas_llm_tanh_linear(x2d, self.w_llm, self.b_llm)  # bf16

        # Static gather sizes (the original uses data-dependent boolean indexing,
        # which is not jittable; with static counts the forward jits cleanly).
        # TODO(synk): if the real counts are smaller than the supplied static
        # counts, jnp.nonzero pads with index 0 -> a validity mask would be
        # needed; the explicit-count path below assumes exact counts.
        if num_imgs_for_rec is None:
            num_imgs_for_rec = int(jnp.sum(embeds_gen_mask))   # eager only
        if num_gen_tokens is None:
            num_gen_tokens = int(jnp.sum(ids_gen_mask))        # eager only

        # target_embeds = image_embeds[embeds_gen_mask]
        img_idx = jnp.nonzero(embeds_gen_mask, size=num_imgs_for_rec)[0]
        target_embeds = jnp.take(image_embeds, img_idx, axis=0)       # (Ni, T, Dimg)
        d_img = target_embeds.shape[-1]

        # output_image_embeds = last_hidden_state[ids_gen_mask]  (row-major order)
        row_idx = jnp.nonzero(ids_gen_mask.reshape(-1), size=num_gen_tokens)[0]
        gen_hidden = jnp.take(last_hidden_state, row_idx, axis=0)     # (Ni*T, D) bf16

        # recon = self.output_resampler(gen_hidden); rec_loss = cosine_loss(...)
        # (fused in one Pallas kernel: recon never round-trips through HBM)
        per_row = pallas_resampler_cosine_per_row(
            gen_hidden, self.w_res, self.b_res,
            target_embeds.reshape(-1, d_img))
        rec_loss = jnp.mean(per_row)

        return {"total_loss": rec_loss, "rec_loss": rec_loss}


# --------------------------- pure-JAX reference -----------------------------

def _reference_loss(params, input_ids, image_embeds, embeds_gen_mask, ids_gen_mask):
    emb = jnp.take(params["embed_table"], input_ids, axis=0)
    bz, sq, dim = emb.shape
    h = jnp.tanh(emb.reshape(bz * sq, dim) @ params["w_llm"] + params["b_llm"])
    tgt = image_embeds[jnp.asarray(embeds_gen_mask)]                  # eager bool ok
    rows = h[jnp.asarray(ids_gen_mask).reshape(-1)]
    rec = rows @ params["w_res"] + params["b_res"]
    tgt2 = tgt.reshape(-1, tgt.shape[-1])
    tgt_n = tgt2 / jnp.linalg.norm(tgt2, axis=-1, keepdims=True)
    rec_n = rec / jnp.linalg.norm(rec, axis=-1, keepdims=True)
    return jnp.mean(1.0 - jnp.sum(tgt_n * rec_n, axis=-1))


# ----------------------------------- main -----------------------------------

if __name__ == "__main__":
    key = jax.random.PRNGKey(0)
    k_emb, k_wl, k_bl, k_wr, k_br, k_ids, k_img = jax.random.split(key, 7)

    # small but lane-aligned shapes (last dims multiples of 128)
    VOCAB, DIM, D_IMG = 512, 256, 128
    BZ, SQ = 2, 64                 # 128 token rows
    N_IMGS, T_IMG = 2, 8           # 16 generation-token rows

    params = {
        "embed_table": jax.random.normal(k_emb, (VOCAB, DIM), jnp.float32) * 0.02,
        "w_llm": jax.random.normal(k_wl, (DIM, DIM), jnp.float32) * 0.05,
        "b_llm": jax.random.normal(k_bl, (DIM,), jnp.float32) * 0.01,
        "w_res": jax.random.normal(k_wr, (DIM, D_IMG), jnp.float32) * 0.05,
        "b_res": jax.random.normal(k_br, (D_IMG,), jnp.float32) * 0.01,
    }

    input_ids = jax.random.randint(k_ids, (BZ, SQ), 0, VOCAB, dtype=jnp.int32)
    attention_mask = jnp.ones((BZ, SQ), jnp.int32)
    labels = input_ids  # unused by the returned loss (matches original semantics)
    image_embeds = jax.random.normal(k_img, (N_IMGS, T_IMG, D_IMG), jnp.float32)

    # both images are generation targets
    embeds_gen_mask = jnp.array([True, True])
    embeds_cmp_mask = jnp.array([False, False])

    # each sample has T_IMG generation-token positions (positions 4:12)
    ids_gen_mask = jnp.zeros((BZ, SQ), bool).at[:, 4:4 + T_IMG].set(True)
    ids_cmp_mask = jnp.zeros((BZ, SQ), bool)

    model = SEEDLLaMAAlignGenerationPallas(params)
    out = model.forward(input_ids, attention_mask, labels, image_embeds,
                        embeds_gen_mask, embeds_cmp_mask,
                        ids_gen_mask, ids_cmp_mask,
                        num_imgs_for_rec=N_IMGS,
                        num_gen_tokens=N_IMGS * T_IMG)
    loss = jax.block_until_ready(out["total_loss"])

    ref = _reference_loss(params, input_ids, image_embeds,
                          embeds_gen_mask, ids_gen_mask)

    assert loss.shape == () and bool(jnp.isfinite(loss))
    assert abs(float(loss) - float(ref)) < 5e-2, (float(loss), float(ref))
    print("KERNEL_OK")
</pallas_src>

<mosaic_0001>
module attributes {stable_mosaic.version = 11 : i64} {
  func.func @_llm_tanh_matmul_kernel(%arg0: i32, %arg1: i32, %arg2: i32, %arg3: memref<128x256xbf16, #tpu.memory_space<vmem>>, %arg4: memref<256x256xbf16, #tpu.memory_space<vmem>>, %arg5: memref<1x256xf32, #tpu.memory_space<vmem>>, %arg6: memref<128x256xbf16, #tpu.memory_space<vmem>>, %arg7: memref<128x256xf32, #tpu.memory_space<vmem>>) attributes {dimension_semantics = [#tpu.dimension_semantics<parallel>, #tpu.dimension_semantics<parallel>, #tpu.dimension_semantics<arbitrary>], iteration_bounds = array<i64: 1, 1, 1>, scalar_prefetch = 0 : i64, scratch_operands = 1 : i64, tpu.core_type = #tpu.core_type<tc>, window_params = [{transform_indices = @transform_0, window_bounds = array<i64: 128, 256>}, {transform_indices = @transform_1, window_bounds = array<i64: 256, 256>}, {transform_indices = @transform_2, window_bounds = array<i64: 1, 256>}, {transform_indices = @transform_3, window_bounds = array<i64: 128, 256>}]} {
    %c0_i32 = arith.constant 0 : i32
    %0 = arith.cmpi eq, %arg2, %c0_i32 : i32
    %1 = arith.extui %0 : i1 to i32
    %c0_i32_0 = arith.constant 0 : i32
    %2 = arith.cmpi ne, %1, %c0_i32_0 : i32
    scf.if %2 {
      %cst_10 = arith.constant 0.000000e+00 : f32
      %12 = vector.broadcast %cst_10 : f32 to vector<128x256xf32>
      %c0_11 = arith.constant 0 : index
      %c0_12 = arith.constant 0 : index
      %13 = vector.load %arg7[%c0_11, %c0_12] : memref<128x256xf32, #tpu.memory_space<vmem>>, vector<128x256xf32>
      tpu.vector_store %arg7[%c0_11, %c0_12], %12 {strides = array<i32>} : memref<128x256xf32, #tpu.memory_space<vmem>>, vector<128x256xf32>,
    } else {
    }
    %c0 = arith.constant 0 : index
    %c0_1 = arith.constant 0 : index
    %3 = vector.load %arg7[%c0, %c0_1] : memref<128x256xf32, #tpu.memory_space<vmem>>, vector<128x256xf32>
    %c0_2 = arith.constant 0 : index
    %c0_3 = arith.constant 0 : index
    %4 = vector.load %arg3[%c0_2, %c0_3] : memref<128x256xbf16, #tpu.memory_space<vmem>>, vector<128x256xbf16>
    %c0_4 = arith.constant 0 : index
    %c0_5 = arith.constant 0 : index
    %5 = vector.load %arg4[%c0_4, %c0_5] : memref<256x256xbf16, #tpu.memory_space<vmem>>, vector<256x256xbf16>
    %cst = arith.constant dense<0.000000e+00> : vector<128x256xf32>
    %6 = tpu.matmul %4, %5, %cst {dimension_numbers = #tpu.dot_dimension_numbers<[1], [0], [0], [1], [0, 0, 1, 1], [], []>} : vector<128x256xbf16>, vector<256x256xbf16>, vector<128x256xf32> -> vector<128x256xf32>
    %7 = arith.addf %3, %6 : vector<128x256xf32>
    %c0_6 = arith.constant 0 : index
    %c0_7 = arith.constant 0 : index
    %8 = vector.load %arg7[%c0_6, %c0_7] : memref<128x256xf32, #tpu.memory_space<vmem>>, vector<128x256xf32>
    tpu.vector_store %arg7[%c0_6, %c0_7], %7 {strides = array<i32>} : memref<128x256xf32, #tpu.memory_space<vmem>>, vector<128x256xf32>,
    %c0_i32_8 = arith.constant 0 : i32
    %9 = arith.cmpi eq, %arg2, %c0_i32_8 : i32
    %10 = arith.extui %9 : i1 to i32
    %c0_i32_9 = arith.constant 0 : i32
    %11 = arith.cmpi ne, %10, %c0_i32_9 : i32
    scf.if %11 {
      %c0_10 = arith.constant 0 : index
      %c0_11 = arith.constant 0 : index
      %12 = vector.load %arg7[%c0_10, %c0_11] : memref<128x256xf32, #tpu.memory_space<vmem>>, vector<128x256xf32>
      %c0_12 = arith.constant 0 : index
      %c0_13 = arith.constant 0 : index
      %13 = vector.load %arg5[%c0_12, %c0_13] : memref<1x256xf32, #tpu.memory_space<vmem>>, vector<1x256xf32>
      %14 = vector.broadcast %13 : vector<1x256xf32> to vector<128x256xf32>
      %15 = arith.addf %12, %14 : vector<128x256xf32>
      %16 = math.tanh %15 : vector<128x256xf32>
      %17 = arith.truncf %16 : vector<128x256xf32> to vector<128x256xbf16>
      %c0_14 = arith.constant 0 : index
      %c0_15 = arith.constant 0 : index
      %18 = vector.load %arg6[%c0_14, %c0_15] : memref<128x256xbf16, #tpu.memory_space<vmem>>, vector<128x256xbf16>
      tpu.vector_store %arg6[%c0_14, %c0_15], %17 {strides = array<i32>} : memref<128x256xbf16, #tpu.memory_space<vmem>>, vector<128x256xbf16>,
    } else {
    }
    return
  }
  func.func @transform_0(%arg0: i32, %arg1: i32, %arg2: i32) -> (i32, i32) {
    %c0_i32 = arith.constant 0 : i32
    return %arg0, %arg2 : i32, i32
  }
  func.func @transform_1(%arg0: i32, %arg1: i32, %arg2: i32) -> (i32, i32) {
    %c0_i32 = arith.constant 0 : i32
    return %arg2, %arg1 : i32, i32
  }
  func.func @transform_2(%arg0: i32, %arg1: i32, %arg2: i32) -> (i32, i32) {
    %c0_i32 = arith.constant 0 : i32
    %c0_i32_0 = arith.constant 0 : i32
    return %c0_i32, %arg1 : i32, i32
  }
  func.func @transform_3(%arg0: i32, %arg1: i32, %arg2: i32) -> (i32, i32) {
    %c0_i32 = arith.constant 0 : i32
    return %arg0, %arg1 : i32, i32
  }
}

</mosaic_0001>

<bundles_post_ra>
// kernel: tpu_custom_call.1
= control target key start
LH: loop header
LB: loop body
LE: loop exit
PB: predicated region body
PF: predicated region fallthrough
CT: control target
= control target key end

     0   :  { %8 = vsyncpa [#allocation4], 0  ;;  %s1251_s0 = inlined_call_operand.hbm [shape: bf16[128,256], index: 0, kind: input, shape index: {}]   ;;  %s1252_s1 = inlined_call_operand.hbm [shape: bf16[256,256], index: 1, kind: input, shape index: {}]   ;;  %s1253_s2 = inlined_call_operand.vmem [shape: f32[1,256], index: 2, kind: input, shape index: {}]   ;;  %s1254_s3 = inlined_call_operand.hbm [shape: bf16[128,256], index: 3, kind: output, shape index: {}]  }
   0x1   :  { %9 = vsyncpa [#allocation7], 0 }
   0x2   :  { %10 = vsyncpa [#allocation5], 0  ;;  %s1142_s12 = smov [#allocation3]   ;;  %s1070_s16 = scalar_lea.hbm %s1251_s0, 2048 }
   0x3   :  { %s16_s13 = sshll.u32 %s1142_s12, 4  ;;  %p1071_p0 = scmp.ne.s32.totalorder %s1251_s0, %s1070_s16  ;;  %s17_s13 = int_to_ptr.vmem [resolvable:$true] %s16_s13 }
   0x4   :  { %p1074_p1 = scmp.lt.u32.totalorder %s1070_s16, %s1251_s0 }
   0x6   :  { %p1076_p2 = pnand %p1074_p1, %p1071_p0 }
   0x8   :  { %1079 = shalt.err (!%p1076_p2)
}
   0x9   :  { %s1080_s21 = scalar_lea.vmem %s17_s13, 2048  ;;  %p1085_p4 = scmp.lt.s32.totalorder %s17_s13, %s17_s13 }
   0xa   :  { %p1081_p3 = scmp.ne.s32.totalorder %s17_s13, %s1080_s21  ;;  %p1086_p5 = scmp.lt.s32.totalorder %s1080_s21, %s1080_s21 }
   0xc   :  { %p1087_p6 = por %p1086_p5, %p1085_p4 }
   0xe   :  { %p1088_p7 = pnand %p1087_p6, %p1081_p3 }
  0x10   :  { %1091 = shalt.err (!%p1088_p7)
}
  0x11   :  { %s1143_s22 = smov 128   ;;  %s1144_s23 = smov 8  }
  0x12   :  { %22 = dma.hbm_to_vmem [thread:$0]  %s1251_s0, 2048, %s17_s13, [#allocation4], %s1143_s22, %s1143_s22, %s1144_s23  }
  0x13   :  { %s1145_s26 = smov [#allocation6]   ;;  %s1092_s30 = scalar_lea.hbm %s1252_s1, 4096 }
  0x14   :  { %s28_s27 = sshll.u32 %s1145_s26, 4  ;;  %p1093_p8 = scmp.ne.s32.totalorder %s1252_s1, %s1092_s30  ;;  %s29_s27 = int_to_ptr.vmem [resolvable:$true] %s28_s27 }
  0x15   :  { %p1096_p9 = scmp.lt.u32.totalorder %s1092_s30, %s1252_s1 }
  0x17   :  { %p1098_p10 = pnand %p1096_p9, %p1093_p8 }
  0x19   :  { %1101 = shalt.err (!%p1098_p10)
}
  0x1a   :  { %s1102_s8 = scalar_lea.vmem %s29_s27, 4096  ;;  %p1107_p12 = scmp.lt.s32.totalorder %s29_s27, %s29_s27 }
  0x1b   :  { %p1103_p11 = scmp.ne.s32.totalorder %s29_s27, %s1102_s8  ;;  %p1108_p13 = scmp.lt.s32.totalorder %s1102_s8, %s1102_s8 }
  0x1d   :  { %p1109_p0 = por %p1108_p13, %p1107_p12 }
  0x1f   :  { %p1110_p1 = pnand %p1109_p0, %p1103_p11 }
  0x21   :  { %1113 = shalt.err (!%p1110_p1)
}
  0x22   :  { %34 = dma.hbm_to_vmem [thread:$0]  %s1252_s1, 4096, %s29_s27, [#allocation7], %s1143_s22, %s1143_s22, %s1144_s23  }
  0x23   :  { %1136 = dma.done.wait [#allocation4], 2048  }
  0x24   :  { %1137 = vsyncadd [#allocation4], 4294965248 }
  0x25   :  { %1138 = dma.done.wait [#allocation7], 4096  }
  0x26   :  { %1139 = vsyncadd [#allocation7], 4294963200  ;;  %v934_v0 = vld [vmem:[#allocation6 + $0x4] ss:$8 sps:$4 sm:$0xff]   ;;  %v936_v1 = vld [vmem:[#allocation6] ss:$8 sps:$4 sm:$0xff]   ;;  %v613_v48 = vlaneseq }
  0x27   :  { %399 = vmatprep.subr.bf16.mxu0 %v934_v0  ;;  %897 = vmatprep.subr.bf16.mxu1 %v934_v0  ;;  %v937_v2 = vld [vmem:[#allocation6 + $0x14] ss:$8 sps:$4 sm:$0xff]   ;;  %v939_v3 = vld [vmem:[#allocation6 + $0x10] ss:$8 sps:$4 sm:$0xff]   ;;  %v940_v4 = vld [vmem:[#allocation6 + $0x24] ss:$8 sps:$4 sm:$0xff]  }
  0x28   :  { %400 = vmatpush1.bf16.msra.mxu0 %v936_v1  ;;  %913 = vmatpush1.bf16.msra.mxu1 %v936_v1  ;;  %v942_v5 = vld [vmem:[#allocation6 + $0x20] ss:$8 sps:$4 sm:$0xff]   ;;  %v943_v6 = vld [vmem:[#allocation6 + $0x34] ss:$8 sps:$4 sm:$0xff]   ;;  %v945_v7 = vld [vmem:[#allocation6 + $0x30] ss:$8 sps:$4 sm:$0xff]  }
  0x29   :  { %401 = vmatprep.subr.bf16.mxu0 %v937_v2  ;;  %898 = vmatprep.subr.bf16.mxu1 %v937_v2  ;;  %v946_v8 = vld [vmem:[#allocation6 + $0x44] ss:$8 sps:$4 sm:$0xff]   ;;  %v948_v9 = vld [vmem:[#allocation6 + $0x40] ss:$8 sps:$4 sm:$0xff]   ;;  %v949_v10 = vld [vmem:[#allocation6 + $0x54] ss:$8 sps:$4 sm:$0xff]  }
  0x2a   :  { %v951_v11 = vld [vmem:[#allocation6 + $0x50] ss:$8 sps:$4 sm:$0xff]   ;;  %v952_v12 = vld [vmem:[#allocation6 + $0x64] ss:$8 sps:$4 sm:$0xff]   ;;  %v954_v14 = vld [vmem:[#allocation6 + $0x60] ss:$8 sps:$4 sm:$0xff]  }
  0x2b   :  { %v984_v13 = vld [vmem:[#allocation3 + $0x4] ss:$8 sps:$4 sm:$0xff]   ;;  %v955_v16 = vld [vmem:[#allocation6 + $0x74] ss:$8 sps:$4 sm:$0xff]   ;;  %v957_v17 = vld [vmem:[#allocation6 + $0x70] ss:$8 sps:$4 sm:$0xff]  }
  0x2c   :  { %402 = vmatpush1.bf16.msra.mxu0 %v939_v3  ;;  %914 = vmatpush1.bf16.msra.mxu1 %v939_v3  ;;  %v987_v15 = vld [vmem:[#allocation3 + $0x44] ss:$8 sps:$4 sm:$0xff]   ;;  %v960_v19 = vld [vmem:[#allocation6 + $0x80] ss:$8 sps:$4 sm:$0xff]   ;;  %v961_v20 = vld [vmem:[#allocation6 + $0x94] ss:$8 sps:$4 sm:$0xff]  }
  0x2d   :  { %403 = vmatprep.subr.bf16.mxu0 %v940_v4  ;;  %899 = vmatprep.subr.bf16.mxu1 %v940_v4  ;;  %v958_v18 = vld [vmem:[#allocation6 + $0x84] ss:$8 sps:$4 sm:$0xff]   ;;  %v963_v21 = vld [vmem:[#allocation6 + $0x90] ss:$8 sps:$4 sm:$0xff]   ;;  %v966_v23 = vld [vmem:[#allocation6 + $0xa0] ss:$8 sps:$4 sm:$0xff]  }
  0x2e   :  { %431 = vmatprep.mubr.bf16.mxu0 %v984_v13  ;;  %471 = vmatprep.mubr.bf16.mxu1 %v987_v15  ;;  %v964_v22 = vld [vmem:[#allocation6 + $0xa4] ss:$8 sps:$4 sm:$0xff]   ;;  %v967_v24 = vld [vmem:[#allocation6 + $0xb4] ss:$8 sps:$4 sm:$0xff]   ;;  %v969_v25 = vld [vmem:[#allocation6 + $0xb0] ss:$8 sps:$4 sm:$0xff]  }
  0x2f   :  { %v970_v26 = vld [vmem:[#allocation6 + $0xc4] ss:$8 sps:$4 sm:$0xff]   ;;  %v972_v27 = vld [vmem:[#allocation6 + $0xc0] ss:$8 sps:$4 sm:$0xff]   ;;  %v973_v28 = vld [vmem:[#allocation6 + $0xd4] ss:$8 sps:$4 sm:$0xff]  }
  0x30   :  { %404 = vmatpush1.bf16.msra.mxu0 %v942_v5  ;;  %915 = vmatpush1.bf16.msra.mxu1 %v942_v5  ;;  %v975_v29 = vld [vmem:[#allocation6 + $0xd0] ss:$8 sps:$4 sm:$0xff]   ;;  %v976_v30 = vld [vmem:[#allocation6 + $0xe4] ss:$8 sps:$4 sm:$0xff]   ;;  %v978_v31 = vld [vmem:[#allocation6 + $0xe0] ss:$8 sps:$4 sm:$0xff]  }
  0x31   :  { %405 = vmatprep.subr.bf16.mxu0 %v943_v6  ;;  %900 = vmatprep.subr.bf16.mxu1 %v943_v6  ;;  %v979_v32 = vld [vmem:[#allocation6 + $0xf4] ss:$8 sps:$4 sm:$0xff]   ;;  %v981_v33 = vld [vmem:[#allocation6 + $0xf0] ss:$8 sps:$4 sm:$0xff]   ;;  %v982_v34 = vld [vmem:[#allocation3] ss:$8 sps:$4 sm:$0xff]  }
  0x32   :  { %v985_v35 = vld [vmem:[#allocation3 + $0x40] ss:$8 sps:$4 sm:$0xff]   ;;  %v988_v36 = vld [vmem:[#allocation3 + $0x14] ss:$8 sps:$4 sm:$0xff]   ;;  %v992_v38 = vld [vmem:[#allocation3 + $0x10] ss:$8 sps:$4 sm:$0xff]  }
  0x33   :  { %v990_v37 = vld [vmem:[#allocation3 + $0x54] ss:$8 sps:$4 sm:$0xff]   ;;  %v993_v39 = vld [vmem:[#allocation3 + $0x50] ss:$8 sps:$4 sm:$0xff]   ;;  %v994_v40 = vld [vmem:[#allocation3 + $0x24] ss:$8 sps:$4 sm:$0xff]  }
  0x34   :  { %406 = vmatpush1.bf16.msra.mxu0 %v945_v7  ;;  %916 = vmatpush1.bf16.msra.mxu1 %v945_v7  ;;  %v996_v41 = vld [vmem:[#allocation3 + $0x64] ss:$8 sps:$4 sm:$0xff]   ;;  %v998_v42 = vld [vmem:[#allocation3 + $0x20] ss:$8 sps:$4 sm:$0xff]   ;;  %v1000_v44 = vld [vmem:[#allocation3 + $0x34] ss:$8 sps:$4 sm:$0xff]  }
  0x35   :  { %407 = vmatprep.subr.bf16.mxu0 %v946_v8  ;;  %901 = vmatprep.subr.bf16.mxu1 %v946_v8  ;;  %v999_v43 = vld [vmem:[#allocation3 + $0x60] ss:$8 sps:$4 sm:$0xff]   ;;  %v1002_v45 = vld [vmem:[#allocation3 + $0x74] ss:$8 sps:$4 sm:$0xff]   ;;  %v1004_v46 = vld [vmem:[#allocation3 + $0x30] ss:$8 sps:$4 sm:$0xff]  }
  0x36   :  { %v1005_v47 = vld [vmem:[#allocation3 + $0x70] ss:$8 sps:$4 sm:$0xff]   ;;  %v614_v49 = vshrl.u32 %v613_v48, 7  ;;  %v611_v51 = vld [vmem:[%s1253_s2] sm:$0x3]  ;;  %s1146_s2 = smov [#allocation8]  }
  0x37   :  { %s804_s11 = sshll.u32 %s1146_s2, 4  ;;  %s805_s11 = int_to_ptr.vmem [resolvable:$true] %s804_s11 }
  0x38   :  { %408 = vmatpush1.bf16.msra.mxu0 %v948_v9  ;;  %917 = vmatpush1.bf16.msra.mxu1 %v948_v9  ;;  %v615_v50 = vsub.s32 0, %v614_v49  ;;  %v619_v52 = vsub.s32 1, %v614_v49  ;;  %s1114_s12 = scalar_lea.vmem %s805_s11, 2048  ;;  %p1119_p3 = scmp.lt.s32.totalorder %s805_s11, %s805_s11 }
  0x39   :  { %409 = vmatprep.subr.bf16.mxu0 %v949_v10  ;;  %902 = vmatprep.subr.bf16.mxu1 %v949_v10  ;;  %p1115_p2 = scmp.ne.s32.totalorder %s805_s11, %s1114_s12  ;;  %p1120_p4 = scmp.lt.s32.totalorder %s1114_s12, %s1114_s12 }
  0x3a   :  { %v1200_v53 = vrot.slane %v611_v51, %v615_v50  ;;  %v1202_v54 = vrot.slane %v611_v51, %v619_v52 }
  0x3b   :  { %p1121_p5 = por %p1120_p4, %p1119_p3 }
  0x3c   :  { %410 = vmatpush1.bf16.msra.mxu0 %v951_v11  ;;  %918 = vmatpush1.bf16.msra.mxu1 %v951_v11 }
  0x3d   :  { %411 = vmatprep.subr.bf16.mxu0 %v952_v12  ;;  %903 = vmatprep.subr.bf16.mxu1 %v952_v12  ;;  %p1122_p6 = pnand %p1121_p5, %p1115_p2 }
  0x40   :  { %412 = vmatpush1.bf16.msra.mxu0 %v954_v14  ;;  %919 = vmatpush1.bf16.msra.mxu1 %v954_v14 }
  0x41   :  { %413 = vmatprep.subr.bf16.mxu0 %v955_v16  ;;  %904 = vmatprep.subr.bf16.mxu1 %v955_v16 }
  0x44   :  { %414 = vmatpush1.bf16.msra.mxu0 %v957_v17  ;;  %920 = vmatpush1.bf16.msra.mxu1 %v957_v17 }
  0x45   :  { %415 = vmatprep.subr.bf16.mxu0 %v958_v18  ;;  %905 = vmatprep.subr.bf16.mxu1 %v958_v18 }
  0x48   :  { %416 = vmatpush1.bf16.msra.mxu0 %v960_v19  ;;  %921 = vmatpush1.bf16.msra.mxu1 %v960_v19 }
  0x49   :  { %417 = vmatprep.subr.bf16.mxu0 %v961_v20  ;;  %906 = vmatprep.subr.bf16.mxu1 %v961_v20 }
  0x4c   :  { %418 = vmatpush1.bf16.msra.mxu0 %v963_v21  ;;  %922 = vmatpush1.bf16.msra.mxu1 %v963_v21 }
  0x4d   :  { %419 = vmatprep.subr.bf16.mxu0 %v964_v22  ;;  %907 = vmatprep.subr.bf16.mxu1 %v964_v22 }
  0x50   :  { %420 = vmatpush1.bf16.msra.mxu0 %v966_v23  ;;  %923 = vmatpush1.bf16.msra.mxu1 %v966_v23 }
  0x51   :  { %421 = vmatprep.subr.bf16.mxu0 %v967_v24  ;;  %908 = vmatprep.subr.bf16.mxu1 %v967_v24 }
  0x54   :  { %422 = vmatpush1.bf16.msra.mxu0 %v969_v25  ;;  %924 = vmatpush1.bf16.msra.mxu1 %v969_v25 }
  0x55   :  { %423 = vmatprep.subr.bf16.mxu0 %v970_v26  ;;  %909 = vmatprep.subr.bf16.mxu1 %v970_v26 }
  0x58   :  { %424 = vmatpush1.bf16.msra.mxu0 %v972_v27  ;;  %925 = vmatpush1.bf16.msra.mxu1 %v972_v27 }
  0x59   :  { %425 = vmatprep.subr.bf16.mxu0 %v973_v28  ;;  %910 = vmatprep.subr.bf16.mxu1 %v973_v28 }
  0x5c   :  { %426 = vmatpush1.bf16.msra.mxu0 %v975_v29  ;;  %926 = vmatpush1.bf16.msra.mxu1 %v975_v29 }
  0x5d   :  { %427 = vmatprep.subr.bf16.mxu0 %v976_v30  ;;  %911 = vmatprep.subr.bf16.mxu1 %v976_v30 }
  0x60   :  { %428 = vmatpush1.bf16.msra.mxu0 %v978_v31  ;;  %927 = vmatpush1.bf16.msra.mxu1 %v978_v31 }
  0x61   :  { %429 = vmatprep.subr.bf16.mxu0 %v979_v32  ;;  %912 = vmatprep.subr.bf16.mxu1 %v979_v32 }
  0x64   :  { %430 = vmatpush1.bf16.msra.mxu0 %v981_v33  ;;  %928 = vmatpush1.bf16.msra.mxu1 %v981_v33 }
  0x67   :  { %432 = vmatmul.mubr.bf16.vlgmr.msra.gmra.mrb[0].mxu0 %v982_v34  ;;  %472 = vmatmul.mubr.bf16.vlgmr.msra.gmra.mrb[0].mxu1 %v985_v35 }
  0x68   :  { %441 = vmatprep.mubr.bf16.mxu0 %v988_v36  ;;  %481 = vmatprep.mubr.bf16.mxu1 %v990_v37 }
  0x6f   :  { %442 = vmatmul.mubr.bf16.gmra.mrb[4].mxu0 %v992_v38  ;;  %482 = vmatmul.mubr.bf16.gmra.mrb[4].mxu1 %v993_v39 }
  0x70   :  { %451 = vmatprep.mubr.bf16.mxu0 %v994_v40  ;;  %491 = vmatprep.mubr.bf16.mxu1 %v996_v41 }
  0x77   :  { %452 = vmatmul.mubr.bf16.gmra.mrb[8].mxu0 %v998_v42  ;;  %492 = vmatmul.mubr.bf16.gmra.mrb[8].mxu1 %v999_v43 }
  0x78   :  { %461 = vmatprep.mubr.bf16.mxu0 %v1000_v44  ;;  %501 = vmatprep.mubr.bf16.mxu1 %v1002_v45 }
  0x7f   :  { %462 = vmatmul.mubr.bf16.gmra.mrb[12].mxu0 %v1004_v46  ;;  %502 = vmatmul.mubr.bf16.gmra.mrb[12].mxu1 %v1005_v47 }
 0x13a   :  { %v433_v55 = vpop.f32.mrb[0].mxu0  ;;  %v473_v56 = vpop.f32.mrb[0].mxu1 }
 0x13b   :  { %v623_v57 = vadd.f32 %v1200_v53, %v433_v55  ;;  %v639_v58 = vadd.f32 %v1200_v53, %v473_v56  ;;  %v435_v59 = vpop.f32.mrb[1].mxu0  ;;  %v475_v60 = vpop.f32.mrb[1].mxu1 }
 0x13c   :  { %v624_v61 = vadd.f32 %v1202_v54, %v435_v59  ;;  %v640_v62 = vadd.f32 %v1202_v54, %v475_v60  ;;  %v437_v63 = vpop.f32.mrb[2].mxu0  ;;  %v477_v0 = vpop.f32.mrb[2].mxu1 }
 0x13d   :  { %1006 = vtanh.f32 %v623_v57  ;;  %v625_v1 = vadd.f32 %v1200_v53, %v437_v63  ;;  %v439_v2 = vpop.f32.mrb[3].mxu0  ;;  %v479_v3 = vpop.f32.mrb[3].mxu1  ;;  %v641_v4 = vadd.f32 %v1200_v53, %v477_v0 }
 0x13e   :  { %1008 = vtanh.f32 %v639_v58  ;;  %v626_v5 = vadd.f32 %v1202_v54, %v439_v2  ;;  %v642_v6 = vadd.f32 %v1202_v54, %v479_v3 }
 0x13f   :  { %1010 = vtanh.f32 %v624_v61 }
 0x140   :  { %1012 = vtanh.f32 %v640_v62 }
 0x141   :  { %1014 = vtanh.f32 %v625_v1 }
 0x142   :  { %1016 = vtanh.f32 %v641_v4  ;;  %v443_v7 = vpop.f32.mrb[4].mxu0  ;;  %v483_v8 = vpop.f32.mrb[4].mxu1 }
 0x143   :  { %1018 = vtanh.f32 %v626_v5  ;;  %v627_v9 = vadd.f32 %v1200_v53, %v443_v7  ;;  %v643_v10 = vadd.f32 %v1200_v53, %v483_v8  ;;  %v445_v11 = vpop.f32.mrb[5].mxu0  ;;  %v485_v12 = vpop.f32.mrb[5].mxu1 }
 0x144   :  { %1020 = vtanh.f32 %v642_v6  ;;  %v628_v13 = vadd.f32 %v1202_v54, %v445_v11  ;;  %v644_v14 = vadd.f32 %v1202_v54, %v485_v12  ;;  %v447_v15 = vpop.f32.mrb[6].mxu0  ;;  %v487_v16 = vpop.f32.mrb[6].mxu1 }
 0x145   :  { %1022 = vtanh.f32 %v627_v9  ;;  %v629_v17 = vadd.f32 %v1200_v53, %v447_v15  ;;  %v449_v18 = vpop.f32.mrb[7].mxu0  ;;  %v489_v19 = vpop.f32.mrb[7].mxu1  ;;  %v645_v20 = vadd.f32 %v1200_v53, %v487_v16 }
 0x146   :  { %1024 = vtanh.f32 %v643_v10  ;;  %v630_v22 = vadd.f32 %v1202_v54, %v449_v18  ;;  %v646_v24 = vadd.f32 %v1202_v54, %v489_v19 }
 0x147   :  { %v1007_v21 = vpop.eup %1006  ;;  %1026 = vtanh.f32 %v628_v13 }
 0x148   :  { %v1009_v23 = vpop.eup %1008  ;;  %1028 = vtanh.f32 %v644_v14 }
 0x149   :  { %v1011_v25 = vpop.eup %1010  ;;  %1030 = vtanh.f32 %v629_v17 }
 0x14a   :  { %v1013_v26 = vpop.eup %1012  ;;  %v881_v27 = vpack.c.bf16 %v1011_v25, %v1007_v21  ;;  %1032 = vtanh.f32 %v645_v20  ;;  %v453_v28 = vpop.f32.mrb[8].mxu0 }
 0x14b   :  { %v493_v29 = vpop.f32.mrb[8].mxu1  ;;  %v1015_v30 = vpop.eup %1014  ;;  %v889_v31 = vpack.c.bf16 %v1013_v26, %v1009_v23  ;;  %1034 = vtanh.f32 %v630_v22  ;;  %v631_v32 = vadd.f32 %v1200_v53, %v453_v28 }
 0x14c   :  { %v647_v33 = vadd.f32 %v1200_v53, %v493_v29  ;;  %v455_v34 = vpop.f32.mrb[9].mxu0  ;;  %v495_v35 = vpop.f32.mrb[9].mxu1  ;;  %783 = vst [vmem:[#allocation8] sm:$0xff] %v881_v27  ;;  %1036 = vtanh.f32 %v646_v24 }
 0x14d   :  { %v1017_v36 = vpop.eup %1016  ;;  %v632_v37 = vadd.f32 %v1202_v54, %v455_v34  ;;  %v648_v38 = vadd.f32 %v1202_v54, %v495_v35  ;;  %v457_v39 = vpop.f32.mrb[10].mxu0  ;;  %791 = vst [vmem:[#allocation8 + $0x40] sm:$0xff] %v889_v31  ;;  %1038 = vtanh.f32 %v631_v32 }
 0x14e   :  { %v497_v40 = vpop.f32.mrb[10].mxu1  ;;  %v1019_v41 = vpop.eup %1018  ;;  %v633_v42 = vadd.f32 %v1200_v53, %v457_v39  ;;  %1040 = vtanh.f32 %v647_v33 }
 0x14f   :  { %v459_v43 = vpop.f32.mrb[11].mxu0  ;;  %v499_v44 = vpop.f32.mrb[11].mxu1  ;;  %v882_v46 = vpack.c.bf16 %v1019_v41, %v1015_v30  ;;  %v649_v47 = vadd.f32 %v1200_v53, %v497_v40  ;;  %1042 = vtanh.f32 %v632_v37 }
 0x150   :  { %v1021_v45 = vpop.eup %1020  ;;  %v634_v50 = vadd.f32 %v1202_v54, %v459_v43  ;;  %1044 = vtanh.f32 %v648_v38  ;;  %v650_v52 = vadd.f32 %v1202_v54, %v499_v44 }
 0x151   :  { %v1023_v48 = vpop.eup %1022  ;;  %v890_v49 = vpack.c.bf16 %v1021_v45, %v1017_v36  ;;  %784 = vst [vmem:[#allocation8 + $0x8] sm:$0xff] %v882_v46  ;;  %1046 = vtanh.f32 %v633_v42 }
 0x152   :  { %v1025_v51 = vpop.eup %1024  ;;  %1048 = vtanh.f32 %v649_v47  ;;  %v463_v58 = vpop.f32.mrb[12].mxu0 }
 0x153   :  { %v1027_v55 = vpop.eup %1026  ;;  %792 = vst [vmem:[#allocation8 + $0x48] sm:$0xff] %v890_v49  ;;  %v503_v59 = vpop.f32.mrb[12].mxu1  ;;  %1050 = vtanh.f32 %v634_v50  ;;  %v635_v62 = vadd.f32 %v1200_v53, %v463_v58 }
 0x154   :  { %v1029_v56 = vpop.eup %1028  ;;  %v883_v57 = vpack.c.bf16 %v1027_v55, %v1023_v48  ;;  %v651_v63 = vadd.f32 %v1200_v53, %v503_v59  ;;  %v465_v0 = vpop.f32.mrb[13].mxu0  ;;  %1052 = vtanh.f32 %v650_v52 }
 0x155   :  { %v1031_v60 = vpop.eup %1030  ;;  %v891_v61 = vpack.c.bf16 %v1029_v56, %v1025_v51  ;;  %v505_v1 = vpop.f32.mrb[13].mxu1  ;;  %v636_v3 = vadd.f32 %v1202_v54, %v465_v0  ;;  %1054 = vtanh.f32 %v635_v62 }
 0x156   :  { %v1033_v2 = vpop.eup %1032  ;;  %785 = vst [vmem:[#allocation8 + $0x10] sm:$0xff] %v883_v57  ;;  %v652_v4 = vadd.f32 %v1202_v54, %v505_v1  ;;  %v467_v5 = vpop.f32.mrb[14].mxu0  ;;  %1056 = vtanh.f32 %v651_v63 }
 0x157   :  { %v507_v6 = vpop.f32.mrb[14].mxu1  ;;  %v1035_v7 = vpop.eup %1034  ;;  %793 = vst [vmem:[#allocation8 + $0x50] sm:$0xff] %v891_v61  ;;  %v637_v8 = vadd.f32 %v1200_v53, %v467_v5  ;;  %1058 = vtanh.f32 %v636_v3 }
 0x158   :  { %v469_v9 = vpop.f32.mrb[15].mxu0  ;;  %v509_v10 = vpop.f32.mrb[15].mxu1  ;;  %v884_v12 = vpack.c.bf16 %v1035_v7, %v1031_v60  ;;  %v653_v13 = vadd.f32 %v1200_v53, %v507_v6  ;;  %1060 = vtanh.f32 %v652_v4 }
 0x159   :  { %v1037_v11 = vpop.eup %1036  ;;  %v638_v16 = vadd.f32 %v1202_v54, %v469_v9  ;;  %v654_v18 = vadd.f32 %v1202_v54, %v509_v10  ;;  %1062 = vtanh.f32 %v637_v8 }
 0x15a   :  { %v1039_v14 = vpop.eup %1038  ;;  %v892_v15 = vpack.c.bf16 %v1037_v11, %v1033_v2  ;;  %786 = vst [vmem:[#allocation8 + $0x18] sm:$0xff] %v884_v12  ;;  %1064 = vtanh.f32 %v653_v13 }
 0x15b   :  { %v1041_v17 = vpop.eup %1040  ;;  %1066 = vtanh.f32 %v638_v16 }
 0x15c   :  { %v1043_v19 = vpop.eup %1042  ;;  %794 = vst [vmem:[#allocation8 + $0x58] sm:$0xff] %v892_v15  ;;  %1068 = vtanh.f32 %v654_v18 }
 0x15d   :  { %v1045_v20 = vpop.eup %1044  ;;  %v885_v21 = vpack.c.bf16 %v1043_v19, %v1039_v14 }
 0x15e   :  { %v1047_v22 = vpop.eup %1046  ;;  %v893_v23 = vpack.c.bf16 %v1045_v20, %v1041_v17 }
 0x15f   :  { %v1049_v53 = vpop.eup %1048  ;;  %787 = vst [vmem:[#allocation8 + $0x20] sm:$0xff] %v885_v21 }
 0x160   :  { %v1051_v24 = vpop.eup %1050  ;;  %795 = vst [vmem:[#allocation8 + $0x60] sm:$0xff] %v893_v23 }
 0x161   :  { %v1053_v25 = vpop.eup %1052  ;;  %v886_v26 = vpack.c.bf16 %v1051_v24, %v1047_v22 }
 0x162   :  { %v1055_v27 = vpop.eup %1054  ;;  %v894_v28 = vpack.c.bf16 %v1053_v25, %v1049_v53 }
 0x163   :  { %v1057_v29 = vpop.eup %1056  ;;  %788 = vst [vmem:[#allocation8 + $0x28] sm:$0xff] %v886_v26 }
 0x164   :  { %v1059_v54 = vpop.eup %1058  ;;  %796 = vst [vmem:[#allocation8 + $0x68] sm:$0xff] %v894_v28 }
 0x165   :  { %v1061_v30 = vpop.eup %1060  ;;  %v887_v31 = vpack.c.bf16 %v1059_v54, %v1055_v27 }
 0x166   :  { %v1063_v32 = vpop.eup %1062  ;;  %v895_v33 = vpack.c.bf16 %v1061_v30, %v1057_v29 }
 0x167   :  { %v1065_v34 = vpop.eup %1064  ;;  %789 = vst [vmem:[#allocation8 + $0x30] sm:$0xff] %v887_v31 }
 0x168   :  { %v1067_v35 = vpop.eup %1066  ;;  %797 = vst [vmem:[#allocation8 + $0x70] sm:$0xff] %v895_v33 }
 0x169   :  { %v1069_v36 = vpop.eup %1068  ;;  %v888_v37 = vpack.c.bf16 %v1067_v35, %v1063_v32 }
 0x16a   :  { %v896_v38 = vpack.c.bf16 %v1069_v36, %v1065_v34 }
 0x16b   :  { %790 = vst [vmem:[#allocation8 + $0x38] sm:$0xff] %v888_v37 }
 0x16c   :  { %798 = vst [vmem:[#allocation8 + $0x78] sm:$0xff] %v896_v38 }
 0x16d   :  { %1125 = shalt.err (!%p1122_p6)
}
 0x16e   :  { %s1126_s15 = scalar_lea.hbm %s1254_s3, 2048 }
 0x16f   :  { %p1127_p7 = scmp.ne.s32.totalorder %s1254_s3, %s1126_s15  ;;  %p1130_p8 = scmp.lt.u32.totalorder %s1126_s15, %s1254_s3 }
 0x171   :  { %p1132_p9 = pnand %p1130_p8, %p1127_p7 }
 0x173   :  { %1135 = shalt.err (!%p1132_p9)
}
 0x174   :  { %810 = dma.vmem_to_hbm [thread:$0]  %s805_s11, 2048, %s1254_s3, [#allocation5], %s1143_s22, %s1143_s22, %s1144_s23  }
 0x175   :  { %1140 = dma.done.wait [#allocation5], 2048  }
 0x176   :  { %1141 = vsyncadd [#allocation5], 4294965248 }
 0x177   :  { %814 = vsyncpa [#allocation4], 1 }
 0x178   :  { %815 = vsyncpa [#allocation7], 1 }
 0x179   :  { %816 = vsyncpa [#allocation5], 1 }

</bundles_post_ra>
